<compile_context>
chip_gen: v7x
topology: tpu7x:2x2x1
jax: 0.10.0
libtpu: 0.0.40
codegen_flags: <defaults>
</compile_context>

<pallas_src>
import functools

import jax
import jax.numpy as jnp
from jax import lax
from jax.experimental import pallas as pl
from jax.experimental.pallas import tpu as pltpu


def _round_up(x, m):
    return ((x + m - 1) // m) * m


def _probe_single_buffer():
    """Explicit capability check for pipeline_mode=pl.Buffered(1) (no silent fallback)."""
    if not hasattr(pl, "Buffered"):
        return False
    try:
        pl.BlockSpec((8, 128), lambda i: (0, 0), pipeline_mode=pl.Buffered(1))
        return True
    except Exception:
        return False


_SINGLE_BUFFER_WEIGHTS = _probe_single_buffer()
_WEIGHT_BUFS = 1 if _SINGLE_BUFFER_WEIGHTS else 2


def _vmem_budget():
    """Generation-aware VMEM budget (bytes) and compiler vmem limit."""
    cap = 64 * 1024 * 1024  # conservative fallback (v7x per-TC VMEM)
    try:
        info = pltpu.get_tpu_info()
        cap_attr = getattr(info, "vmem_capacity_bytes", None)
        if cap_attr:
            cap = int(cap_attr)
    except Exception:
        pass
    budget = int(cap * 0.70)
    limit = min(int(cap * 0.75), 100 * 1024 * 1024)
    return budget, limit


def _choose_tiles(n_rows, d_in_p, d_hid_128, x_itemsize, w_itemsize, budget):
    """Pick (tm, tk): biggest MXU-friendly tiles that fit the VMEM budget."""
    weight_budget = budget // 2

    # (a) hidden-dim tile tk: keep the weights fully resident when they fit
    # (single K step, single-buffered when supported); otherwise tile the reduction
    # dim -- the per-chunk weight slabs are then double-buffered by the pipeline.
    resident_bytes = 2 * d_in_p * d_hid_128 * w_itemsize * _WEIGHT_BUFS
    if resident_bytes <= weight_budget:
        tk = d_hid_128
        weight_bytes = resident_bytes
    else:
        tk = 512
        for cand in (2048, 1024, 512):
            if 4 * d_in_p * cand * w_itemsize <= weight_budget:
                tk = cand
                break
        weight_bytes = 4 * d_in_p * tk * w_itemsize

    # (b) row tile tm against what is left of the budget (accurate buffer counts).
    const_bytes = weight_bytes + 8 * (tk + 3 * d_in_p) * w_itemsize  # biases / LN params
    avail = max(budget - const_bytes, 0)
    per_row = (4 * d_in_p * x_itemsize      # double-buffered x and out tiles
               + 4 * d_in_p                 # f32 accumulator scratch
               + tk * (4 + x_itemsize)      # f32 hidden chunk + its compute-dtype copy
               + 12 * d_in_p)               # f32 residual / LayerNorm temporaries
    tm_max = avail // per_row
    tm = 8
    for cand in (1024, 512, 256, 128, 64, 32, 16, 8):
        if tm_max >= cand:
            tm = cand
            break
    # Never use a tile larger than the (8-aligned) number of rows.
    return int(min(tm, _round_up(n_rows, 8))), int(tk)


def _weight_spec(shape, index_map, resident):
    """Weight BlockSpec; single-buffered when grid-invariant (zero pipelining cost)."""
    if resident and _SINGLE_BUFFER_WEIGHTS:
        return pl.BlockSpec(shape, index_map, pipeline_mode=pl.Buffered(1))
    return pl.BlockSpec(shape, index_map)


def _pad2(a, rows, cols):
    pr, pc = rows - a.shape[0], cols - a.shape[1]
    if pr == 0 and pc == 0:
        return a
    return jnp.pad(a, ((0, pr), (0, pc)))


def ffn_ln_kernel(x_ref, w1_ref, b1_ref, w2_ref, b2_ref, g_ref, beta_ref, o_ref,
                  acc_ref, *, d_in, d_in_pad, eps, compute_dtype):
    k = pl.program_id(1)

    @pl.when(k == 0)
    def _():
        acc_ref[...] = jnp.zeros_like(acc_ref)

    x = x_ref[...]
    xc = x.astype(compute_dtype)

    # w_1 chunk (1x1 conv == linear) + bias + ReLU.  Cast back to the MXU dtype
    # immediately so the (tm, tk) intermediate that may spill to VMEM is narrow.
    h = jnp.dot(xc, w1_ref[...], preferred_element_type=jnp.float32)
    h = jnp.maximum(h + b1_ref[...].astype(jnp.float32), 0.0).astype(compute_dtype)

    # Partial w_2 contribution for this hidden chunk, accumulated in f32.
    acc_ref[...] += jnp.dot(h, w2_ref[...], preferred_element_type=jnp.float32)

    @pl.when(k == pl.num_programs(1) - 1)
    def _():
        y = acc_ref[...] + b2_ref[...].astype(jnp.float32)
        # TODO(synk): dropout (p=0.1) omitted -- identity in eval mode.
        z = y + x.astype(jnp.float32)                      # residual add in f32
        if d_in_pad == d_in:
            u = jnp.mean(z, axis=-1, keepdims=True)
            s = jnp.mean((z - u) ** 2, axis=-1, keepdims=True)
        else:
            # Padded feature columns of z are exactly zero (x, w2 columns, b2 all
            # zero-padded), so only the centered second moment needs masking.
            mask = (lax.broadcasted_iota(jnp.int32, (1, d_in_pad), 1) < d_in
                    ).astype(jnp.float32)
            inv_d = 1.0 / d_in
            u = jnp.sum(z, axis=-1, keepdims=True) * inv_d
            s = jnp.sum(((z - u) ** 2) * mask, axis=-1, keepdims=True) * inv_d
        zn = (z - u) * lax.rsqrt(s + eps)                  # rsqrt -> EUP slot
        o_ref[...] = (g_ref[...].astype(jnp.float32) * zn
                      + beta_ref[...].astype(jnp.float32)).astype(o_ref.dtype)


def positionwise_feed_forward(x, w1, b1, w2, b2, gamma, beta, *, eps=1e-12,
                              tm=None, tk=None, compute_dtype=None):
    """x: (B, L, d_in).  w1: (d_in, d_hid), w2: (d_hid, d_in)."""
    B, L, d_in = x.shape
    d_hid = w1.shape[1]
    M = B * L

    if compute_dtype is None:
        compute_dtype = x.dtype          # keep caller precision by default
    compute_dtype = jnp.dtype(compute_dtype)
    x_itemsize = jnp.dtype(x.dtype).itemsize

    # Lane-dense feature dims (multiples of 128) -> unmasked stores on the output path.
    d_in_p = _round_up(d_in, 128)
    d_hid_128 = _round_up(d_hid, 128)

    budget, vmem_limit = _vmem_budget()
    auto_tm, auto_tk = _choose_tiles(M, d_in_p, d_hid_128, x_itemsize,
                                     compute_dtype.itemsize, budget)
    if tm is None:
        tm = auto_tm
    if tk is None:
        tk = auto_tk
    tk = max(128, _round_up(tk, 128))
    d_hid_p = _round_up(d_hid, tk)
    n_k = d_hid_p // tk
    resident = n_k == 1                  # weights grid-invariant -> single-buffer them
    M_p = _round_up(M, tm)

    # Wrapper-side padding (skipped when it is a no-op; typical transformer d_in is
    # already a multiple of 128, so usually only M gets padded, which is cheap).
    x2 = x.reshape(M, d_in)
    x2 = _pad2(x2, M_p, d_in_p)
    w1p = _pad2(w1, d_in_p, d_hid_p).astype(compute_dtype)
    w2p = _pad2(w2, d_hid_p, d_in_p).astype(compute_dtype)
    b1p = _pad2(b1.reshape(1, d_hid), 1, d_hid_p)
    b2p = _pad2(b2.reshape(1, d_in), 1, d_in_p)
    gp = _pad2(gamma.reshape(1, d_in), 1, d_in_p)
    bp = _pad2(beta.reshape(1, d_in), 1, d_in_p)

    kernel = functools.partial(ffn_ln_kernel, d_in=d_in, d_in_pad=d_in_p, eps=eps,
                               compute_dtype=compute_dtype)

    # Advisory cost hint so XLA can schedule surrounding ops around the kernel.
    cost = pl.CostEstimate(
        flops=4 * M_p * d_in_p * d_hid_p,
        transcendentals=M_p,
        bytes_accessed=(2 * M_p * d_in_p * x_itemsize
                        + 2 * d_in_p * d_hid_p * compute_dtype.itemsize
                        + 4 * (d_hid_p + 3 * d_in_p)),
    )

    out = pl.pallas_call(
        kernel,
        out_shape=jax.ShapeDtypeStruct((M_p, d_in_p), x.dtype),
        grid_spec=pltpu.PrefetchScalarGridSpec(
            num_scalar_prefetch=0,
            # Row tiles ("parallel", splittable across v7x's 2 TCs) x hidden-dim
            # reduction chunks ("arbitrary", last).
            grid=(M_p // tm, n_k),
            in_specs=[
                pl.BlockSpec((tm, d_in_p), lambda i, k: (i, 0)),        # x tile
                _weight_spec((d_in_p, tk), lambda i, k: (0, k), resident),  # w1 chunk
                pl.BlockSpec((1, tk), lambda i, k: (0, k)),             # b1 chunk
                _weight_spec((tk, d_in_p), lambda i, k: (k, 0), resident),  # w2 chunk
                pl.BlockSpec((1, d_in_p), lambda i, k: (0, 0)),         # b2
                pl.BlockSpec((1, d_in_p), lambda i, k: (0, 0)),         # gamma
                pl.BlockSpec((1, d_in_p), lambda i, k: (0, 0)),         # beta
            ],
            out_specs=pl.BlockSpec((tm, d_in_p), lambda i, k: (i, 0)),
            scratch_shapes=[pltpu.VMEM((tm, d_in_p), jnp.float32)],     # f32 accumulator
        ),
        compiler_params=pltpu.CompilerParams(
            dimension_semantics=("parallel", "arbitrary"),
            vmem_limit_bytes=vmem_limit,
        ),
        cost_estimate=cost,
    )(x2, w1p, b1p, w2p, b2p, gp, bp)

    if M_p == M and d_in_p == d_in:
        return out.reshape(B, L, d_in)
    return out[:M, :d_in].reshape(B, L, d_in)


def _reference(x, w1, b1, w2, b2, gamma, beta, eps=1e-12):
    h = jnp.maximum(jnp.einsum("bld,dh->blh", x, w1) + b1, 0.0)
    y = jnp.einsum("blh,hd->bld", h, w2) + b2
    z = y + x
    u = jnp.mean(z, axis=-1, keepdims=True)
    s = jnp.mean((z - u) ** 2, axis=-1, keepdims=True)
    return gamma * ((z - u) / jnp.sqrt(s + eps)) + beta


if __name__ == "__main__":
    key = jax.random.PRNGKey(0)

    # --- Test 1: small shapes (batch=2, seq=8, d_in=32, d_hid=64); single K step,
    #             padded-feature (masked variance) path. ---
    B, L, d_in, d_hid = 2, 8, 32, 64
    kx, kw1, kb1, kw2, kb2 = jax.random.split(key, 5)
    x = jax.random.normal(kx, (B, L, d_in), dtype=jnp.float32)
    # Conv1d(d_in, d_hid, 1).weight has shape (d_hid, d_in, 1); stored transposed as
    # (d_in, d_hid) so the kernel computes x @ W1 directly.
    w1 = 0.05 * jax.random.normal(kw1, (d_in, d_hid), dtype=jnp.float32)
    b1 = 0.05 * jax.random.normal(kb1, (d_hid,), dtype=jnp.float32)
    w2 = 0.05 * jax.random.normal(kw2, (d_hid, d_in), dtype=jnp.float32)
    b2 = 0.05 * jax.random.normal(kb2, (d_in,), dtype=jnp.float32)
    gamma = jnp.ones((d_in,), dtype=jnp.float32)
    beta = jnp.zeros((d_in,), dtype=jnp.float32)

    out = jax.block_until_ready(positionwise_feed_forward(x, w1, b1, w2, b2, gamma, beta))
    ref = _reference(x, w1, b1, w2, b2, gamma, beta)
    assert out.shape == (B, L, d_in)
    assert jnp.max(jnp.abs(out - ref)) < 5e-4

    # --- Test 2: exercises the d_hid reduction axis (tk=128 -> 2 K steps) and the
    #             unpadded-feature LayerNorm path (d_in=128). ---
    B2, L2, d_in2, d_hid2 = 2, 8, 128, 256
    k2 = jax.random.split(key, 10)
    x_ = jax.random.normal(k2[5], (B2, L2, d_in2), dtype=jnp.float32)
    w1_ = 0.05 * jax.random.normal(k2[6], (d_in2, d_hid2), dtype=jnp.float32)
    b1_ = 0.05 * jax.random.normal(k2[7], (d_hid2,), dtype=jnp.float32)
    w2_ = 0.05 * jax.random.normal(k2[8], (d_hid2, d_in2), dtype=jnp.float32)
    b2_ = 0.05 * jax.random.normal(k2[9], (d_in2,), dtype=jnp.float32)
    g_ = jnp.ones((d_in2,), dtype=jnp.float32)
    be_ = jnp.zeros((d_in2,), dtype=jnp.float32)

    out2 = jax.block_until_ready(
        positionwise_feed_forward(x_, w1_, b1_, w2_, b2_, g_, be_, tk=128))
    ref2 = _reference(x_, w1_, b1_, w2_, b2_, g_, be_)
    assert out2.shape == (B2, L2, d_in2)
    assert jnp.max(jnp.abs(out2 - ref2)) < 5e-4

    print("KERNEL_OK")
</pallas_src>

<mosaic_0001>
module attributes {stable_mosaic.version = 11 : i64} {
  func.func @ffn_ln_kernel(%arg0: i32, %arg1: i32, %arg2: memref<16x128xf32, #tpu.memory_space<vmem>>, %arg3: memref<128x128xf32, #tpu.memory_space<vmem>>, %arg4: memref<1x128xf32, #tpu.memory_space<vmem>>, %arg5: memref<128x128xf32, #tpu.memory_space<vmem>>, %arg6: memref<1x128xf32, #tpu.memory_space<vmem>>, %arg7: memref<1x128xf32, #tpu.memory_space<vmem>>, %arg8: memref<1x128xf32, #tpu.memory_space<vmem>>, %arg9: memref<16x128xf32, #tpu.memory_space<vmem>>, %arg10: memref<16x128xf32, #tpu.memory_space<vmem>>) attributes {dimension_semantics = [#tpu.dimension_semantics<parallel>, #tpu.dimension_semantics<arbitrary>], iteration_bounds = array<i64: 1, 1>, scalar_prefetch = 0 : i64, scratch_operands = 1 : i64, tpu.core_type = #tpu.core_type<tc>, window_params = [{transform_indices = @transform_0, window_bounds = array<i64: 16, 128>}, {pipeline_mode = #tpu.pipeline_mode<synchronous>, transform_indices = @transform_1, window_bounds = array<i64: 128, 128>}, {transform_indices = @transform_2, window_bounds = array<i64: 1, 128>}, {pipeline_mode = #tpu.pipeline_mode<synchronous>, transform_indices = @transform_3, window_bounds = array<i64: 128, 128>}, {pipeline_mode = #tpu.pipeline_mode<synchronous>, transform_indices = @transform_4, window_bounds = array<i64: 1, 128>}, {pipeline_mode = #tpu.pipeline_mode<synchronous>, transform_indices = @transform_5, window_bounds = array<i64: 1, 128>}, {pipeline_mode = #tpu.pipeline_mode<synchronous>, transform_indices = @transform_6, window_bounds = array<i64: 1, 128>}, {transform_indices = @transform_7, window_bounds = array<i64: 16, 128>}]} {
    %c0_i32 = arith.constant 0 : i32
    %0 = arith.cmpi eq, %arg1, %c0_i32 : i32
    %1 = arith.extui %0 : i1 to i32
    %c0_i32_0 = arith.constant 0 : i32
    %2 = arith.cmpi ne, %1, %c0_i32_0 : i32
    scf.if %2 {
      %cst_16 = arith.constant 0.000000e+00 : f32
      %19 = vector.broadcast %cst_16 : f32 to vector<16x128xf32>
      %c0_17 = arith.constant 0 : index
      %c0_18 = arith.constant 0 : index
      %20 = vector.load %arg10[%c0_17, %c0_18] : memref<16x128xf32, #tpu.memory_space<vmem>>, vector<16x128xf32>
      tpu.vector_store %arg10[%c0_17, %c0_18], %19 {strides = array<i32>} : memref<16x128xf32, #tpu.memory_space<vmem>>, vector<16x128xf32>,
    } else {
    }
    %c0 = arith.constant 0 : index
    %c0_1 = arith.constant 0 : index
    %3 = vector.load %arg2[%c0, %c0_1] : memref<16x128xf32, #tpu.memory_space<vmem>>, vector<16x128xf32>
    %c0_2 = arith.constant 0 : index
    %c0_3 = arith.constant 0 : index
    %4 = vector.load %arg3[%c0_2, %c0_3] : memref<128x128xf32, #tpu.memory_space<vmem>>, vector<128x128xf32>
    %cst = arith.constant dense<0.000000e+00> : vector<16x128xf32>
    %5 = tpu.matmul %3, %4, %cst {dimension_numbers = #tpu.dot_dimension_numbers<[1], [0], [0], [1], [0, 0, 1, 1], [], []>} : vector<16x128xf32>, vector<128x128xf32>, vector<16x128xf32> -> vector<16x128xf32>
    %c0_4 = arith.constant 0 : index
    %c0_5 = arith.constant 0 : index
    %6 = vector.load %arg4[%c0_4, %c0_5] : memref<1x128xf32, #tpu.memory_space<vmem>>, vector<1x128xf32>
    %7 = vector.broadcast %6 : vector<1x128xf32> to vector<16x128xf32>
    %8 = arith.addf %5, %7 : vector<16x128xf32>
    %cst_6 = arith.constant 0.000000e+00 : f32
    %9 = vector.broadcast %cst_6 : f32 to vector<16x128xf32>
    %10 = arith.maximumf %8, %9 : vector<16x128xf32>
    %c0_7 = arith.constant 0 : index
    %c0_8 = arith.constant 0 : index
    %11 = vector.load %arg10[%c0_7, %c0_8] : memref<16x128xf32, #tpu.memory_space<vmem>>, vector<16x128xf32>
    %c0_9 = arith.constant 0 : index
    %c0_10 = arith.constant 0 : index
    %12 = vector.load %arg5[%c0_9, %c0_10] : memref<128x128xf32, #tpu.memory_space<vmem>>, vector<128x128xf32>
    %cst_11 = arith.constant dense<0.000000e+00> : vector<16x128xf32>
    %13 = tpu.matmul %10, %12, %cst_11 {dimension_numbers = #tpu.dot_dimension_numbers<[1], [0], [0], [1], [0, 0, 1, 1], [], []>} : vector<16x128xf32>, vector<128x128xf32>, vector<16x128xf32> -> vector<16x128xf32>
    %14 = arith.addf %11, %13 : vector<16x128xf32>
    %c0_12 = arith.constant 0 : index
    %c0_13 = arith.constant 0 : index
    %15 = vector.load %arg10[%c0_12, %c0_13] : memref<16x128xf32, #tpu.memory_space<vmem>>, vector<16x128xf32>
    tpu.vector_store %arg10[%c0_12, %c0_13], %14 {strides = array<i32>} : memref<16x128xf32, #tpu.memory_space<vmem>>, vector<16x128xf32>,
    %c0_i32_14 = arith.constant 0 : i32
    %16 = arith.cmpi eq, %arg1, %c0_i32_14 : i32
    %17 = arith.extui %16 : i1 to i32
    %c0_i32_15 = arith.constant 0 : i32
    %18 = arith.cmpi ne, %17, %c0_i32_15 : i32
    scf.if %18 {
      %c0_16 = arith.constant 0 : index
      %c0_17 = arith.constant 0 : index
      %19 = vector.load %arg10[%c0_16, %c0_17] : memref<16x128xf32, #tpu.memory_space<vmem>>, vector<16x128xf32>
      %c0_18 = arith.constant 0 : index
      %c0_19 = arith.constant 0 : index
      %20 = vector.load %arg6[%c0_18, %c0_19] : memref<1x128xf32, #tpu.memory_space<vmem>>, vector<1x128xf32>
      %21 = vector.broadcast %20 : vector<1x128xf32> to vector<16x128xf32>
      %22 = arith.addf %19, %21 : vector<16x128xf32>
      %23 = arith.addf %22, %3 : vector<16x128xf32>
      %24 = tpu.iota {dimensions = array<i32: 1>} : vector<1x128xi32>
      %c32_i32 = arith.constant 32 : i32
      %25 = vector.broadcast %c32_i32 : i32 to vector<1x128xi32>
      %26 = arith.cmpi slt, %24, %25 : vector<1x128xi32>
      %27 = arith.extui %26 : vector<1x128xi1> to vector<1x128xi32>
      %28 = arith.sitofp %27 : vector<1x128xi32> to vector<1x128xf32>
      %cst_20 = arith.constant dense<0.000000e+00> : vector<16xf32>
      %29 = vector.multi_reduction <add>, %23, %cst_20 [1] : vector<16x128xf32> to vector<16xf32>
      %30 = vector.shape_cast %29 : vector<16xf32> to vector<16x1xf32>
      %cst_21 = arith.constant 3.125000e-02 : f32
      %31 = vector.broadcast %cst_21 : f32 to vector<16x1xf32>
      %32 = arith.mulf %30, %31 : vector<16x1xf32>
      %33 = vector.broadcast %32 : vector<16x1xf32> to vector<16x128xf32>
      %34 = arith.subf %23, %33 : vector<16x128xf32>
      %35 = arith.mulf %34, %34 : vector<16x128xf32>
      %36 = vector.broadcast %28 : vector<1x128xf32> to vector<16x128xf32>
      %37 = arith.mulf %35, %36 : vector<16x128xf32>
      %cst_22 = arith.constant dense<0.000000e+00> : vector<16xf32>
      %38 = vector.multi_reduction <add>, %37, %cst_22 [1] : vector<16x128xf32> to vector<16xf32>
      %39 = vector.shape_cast %38 : vector<16xf32> to vector<16x1xf32>
      %cst_23 = arith.constant 3.125000e-02 : f32
      %40 = vector.broadcast %cst_23 : f32 to vector<16x1xf32>
      %41 = arith.mulf %39, %40 : vector<16x1xf32>
      %42 = vector.broadcast %32 : vector<16x1xf32> to vector<16x128xf32>
      %43 = arith.subf %23, %42 : vector<16x128xf32>
      %cst_24 = arith.constant 9.99999996E-13 : f32
      %44 = vector.broadcast %cst_24 : f32 to vector<16x1xf32>
      %45 = arith.addf %41, %44 : vector<16x1xf32>
      %46 = math.rsqrt %45 : vector<16x1xf32>
      %47 = vector.broadcast %46 : vector<16x1xf32> to vector<16x128xf32>
      %48 = arith.mulf %43, %47 : vector<16x128xf32>
      %c0_25 = arith.constant 0 : index
      %c0_26 = arith.constant 0 : index
      %49 = vector.load %arg7[%c0_25, %c0_26] : memref<1x128xf32, #tpu.memory_space<vmem>>, vector<1x128xf32>
      %50 = vector.broadcast %49 : vector<1x128xf32> to vector<16x128xf32>
      %51 = arith.mulf %50, %48 : vector<16x128xf32>
      %c0_27 = arith.constant 0 : index
      %c0_28 = arith.constant 0 : index
      %52 = vector.load %arg8[%c0_27, %c0_28] : memref<1x128xf32, #tpu.memory_space<vmem>>, vector<1x128xf32>
      %53 = vector.broadcast %52 : vector<1x128xf32> to vector<16x128xf32>
      %54 = arith.addf %51, %53 : vector<16x128xf32>
      %c0_29 = arith.constant 0 : index
      %c0_30 = arith.constant 0 : index
      %55 = vector.load %arg9[%c0_29, %c0_30] : memref<16x128xf32, #tpu.memory_space<vmem>>, vector<16x128xf32>
      tpu.vector_store %arg9[%c0_29, %c0_30], %54 {strides = array<i32>} : memref<16x128xf32, #tpu.memory_space<vmem>>, vector<16x128xf32>,
    } else {
    }
    return
  }
  func.func @transform_0(%arg0: i32, %arg1: i32) -> (i32, i32) {
    %c0_i32 = arith.constant 0 : i32
    %c0_i32_0 = arith.constant 0 : i32
    return %arg0, %c0_i32 : i32, i32
  }
  func.func @transform_1(%arg0: i32, %arg1: i32) -> (i32, i32) {
    %c0_i32 = arith.constant 0 : i32
    %c0_i32_0 = arith.constant 0 : i32
    return %c0_i32, %arg1 : i32, i32
  }
  func.func @transform_2(%arg0: i32, %arg1: i32) -> (i32, i32) {
    %c0_i32 = arith.constant 0 : i32
    %c0_i32_0 = arith.constant 0 : i32
    return %c0_i32, %arg1 : i32, i32
  }
  func.func @transform_3(%arg0: i32, %arg1: i32) -> (i32, i32) {
    %c0_i32 = arith.constant 0 : i32
    %c0_i32_0 = arith.constant 0 : i32
    return %arg1, %c0_i32 : i32, i32
  }
  func.func @transform_4(%arg0: i32, %arg1: i32) -> (i32, i32) {
    %c0_i32 = arith.constant 0 : i32
    %c0_i32_0 = arith.constant 0 : i32
    %c0_i32_1 = arith.constant 0 : i32
    return %c0_i32, %c0_i32_0 : i32, i32
  }
  func.func @transform_5(%arg0: i32, %arg1: i32) -> (i32, i32) {
    %c0_i32 = arith.constant 0 : i32
    %c0_i32_0 = arith.constant 0 : i32
    %c0_i32_1 = arith.constant 0 : i32
    return %c0_i32, %c0_i32_0 : i32, i32
  }
  func.func @transform_6(%arg0: i32, %arg1: i32) -> (i32, i32) {
    %c0_i32 = arith.constant 0 : i32
    %c0_i32_0 = arith.constant 0 : i32
    %c0_i32_1 = arith.constant 0 : i32
    return %c0_i32, %c0_i32_0 : i32, i32
  }
  func.func @transform_7(%arg0: i32, %arg1: i32) -> (i32, i32) {
    %c0_i32 = arith.constant 0 : i32
    %c0_i32_0 = arith.constant 0 : i32
    return %arg0, %c0_i32 : i32, i32
  }
}

</mosaic_0001>

<bundles_post_ra>
// kernel: tpu_custom_call.1
= control target key start
LH: loop header
LB: loop body
LE: loop exit
PB: predicated region body
PF: predicated region fallthrough
CT: control target
= control target key end

     0   :  { %12 = vsyncpa [#allocation4], 0  ;;  %s766_s0 = inlined_call_operand.hbm [shape: f32[16,128], index: 0, kind: input, shape index: {}]   ;;  %s767_s1 = inlined_call_operand.hbm [shape: f32[128,128], index: 1, kind: input, shape index: {}]   ;;  %s768_s2 = inlined_call_operand.vmem [shape: f32[1,128], index: 2, kind: input, shape index: {}]   ;;  %s769_s3 = inlined_call_operand.hbm [shape: f32[128,128], index: 3, kind: input, shape index: {}]   ;;  %s770_s4 = inlined_call_operand.vmem [shape: f32[1,128], index: 4, kind: input, shape index: {}]   ;;  %s771_s5 = inlined_call_operand.vmem [shape: f32[1,128], index: 5, kind: input, shape index: {}]   ;;  %s772_s6 = inlined_call_operand.vmem [shape: f32[1,128], index: 6, kind: input, shape index: {}]   ;;  %s773_s7 = inlined_call_operand.hbm [shape: f32[16,128], index: 7, kind: output, shape index: {}]  }
   0x1   :  { %13 = vsyncpa [#allocation7], 0 }
   0x2   :  { %14 = vsyncpa [#allocation5], 0  ;;  %s636_s24 = smov [#allocation6]   ;;  %s637_s26 = smov [#allocation3]  }
   0x3   :  { %s32_s25 = sshll.u32 %s636_s24, 4  ;;  %s20_s27 = sshll.u32 %s637_s26, 4  ;;  %s33_s25 = int_to_ptr.vmem [resolvable:$true] %s32_s25  ;;  %s683_s27 = int_to_ptr.vmem [resolvable:$true] %s20_s27 }
   0x4   :  { %s542_s30 = scalar_lea.hbm %s767_s1, 2048 }
   0x5   :  { %p543_p0 = scmp.ne.s32.totalorder %s767_s1, %s542_s30  ;;  %p546_p1 = scmp.lt.u32.totalorder %s542_s30, %s767_s1 }
   0x7   :  { %p548_p2 = pnand %p546_p1, %p543_p0 }
   0x9   :  { %551 = shalt.err (!%p548_p2)
}
   0xa   :  { %s552_s12 = scalar_lea.vmem %s33_s25, 2048  ;;  %p557_p4 = scmp.lt.s32.totalorder %s33_s25, %s33_s25 }
   0xb   :  { %p553_p3 = scmp.ne.s32.totalorder %s33_s25, %s552_s12  ;;  %p558_p5 = scmp.lt.s32.totalorder %s552_s12, %s552_s12 }
   0xd   :  { %p559_p6 = por %p558_p5, %p557_p4 }
   0xf   :  { %p560_p7 = pnand %p559_p6, %p553_p3 }
  0x11   :  { %563 = shalt.err (!%p560_p7)
}
  0x12   :  { %s638_s13 = smov 128   ;;  %s639_s14 = smov 8  }
  0x13   :  { %38 = dma.hbm_to_vmem [thread:$0]  %s767_s1, 2048, %s33_s25, [#allocation7], %s638_s13, %s638_s13, %s639_s14  }
  0x14   :  { %s564_s19 = scalar_lea.hbm %s766_s0, 256 }
  0x15   :  { %p565_p8 = scmp.ne.s32.totalorder %s766_s0, %s564_s19  ;;  %p568_p9 = scmp.lt.u32.totalorder %s564_s19, %s766_s0 }
  0x17   :  { %p570_p10 = pnand %p568_p9, %p565_p8 }
  0x19   :  { %573 = shalt.err (!%p570_p10)
}
  0x1a   :  { %s574_s24 = scalar_lea.vmem %s683_s27, 256  ;;  %p579_p12 = scmp.lt.s32.totalorder %s683_s27, %s683_s27 }
  0x1b   :  { %p575_p11 = scmp.ne.s32.totalorder %s683_s27, %s574_s24  ;;  %p580_p13 = scmp.lt.s32.totalorder %s574_s24, %s574_s24 }
  0x1d   :  { %p581_p0 = por %p580_p13, %p579_p12 }
  0x1f   :  { %p582_p1 = pnand %p581_p0, %p575_p11 }
  0x21   :  { %585 = shalt.err (!%p582_p1)
}
  0x22   :  { %26 = dma.hbm_to_vmem [thread:$0]  %s766_s0, 256, %s683_s27, [#allocation4], %s638_s13, %s638_s13, %s639_s14  }
  0x23   :  { %s640_s26 = smov [#allocation8]   ;;  %s586_s8 = scalar_lea.hbm %s769_s3, 2048 }
  0x24   :  { %s46_s28 = sshll.u32 %s640_s26, 4  ;;  %p587_p2 = scmp.ne.s32.totalorder %s769_s3, %s586_s8  ;;  %s47_s28 = int_to_ptr.vmem [resolvable:$true] %s46_s28 }
  0x25   :  { %p590_p3 = scmp.lt.u32.totalorder %s586_s8, %s769_s3 }
  0x27   :  { %p592_p4 = pnand %p590_p3, %p587_p2 }
  0x29   :  { %595 = shalt.err (!%p592_p4)
}
  0x2a   :  { %s596_s15 = scalar_lea.vmem %s47_s28, 2048  ;;  %p601_p6 = scmp.lt.s32.totalorder %s47_s28, %s47_s28 }
  0x2b   :  { %p597_p5 = scmp.ne.s32.totalorder %s47_s28, %s596_s15  ;;  %p602_p7 = scmp.lt.s32.totalorder %s596_s15, %s596_s15 }
  0x2d   :  { %p603_p8 = por %p602_p7, %p601_p6 }
  0x2f   :  { %p604_p9 = pnand %p603_p8, %p597_p5 }
  0x31   :  { %607 = shalt.err (!%p604_p9)
}
  0x32   :  { %52 = dma.hbm_to_vmem [thread:$0]  %s769_s3, 2048, %s47_s28, [#allocation7], %s638_s13, %s638_s13, %s639_s14  }
  0x33   :  { %630 = dma.done.wait [#allocation4], 256  }
  0x34   :  { %631 = vsyncadd [#allocation4], 4294967040 }
  0x35   :  { %632 = dma.done.wait [#allocation7], 4096  }
  0x36   :  { %633 = vsyncadd [#allocation7], 4294963200  ;;  %v76_v0 = vld [vmem:[#allocation6] sm:$0xff]  ;;  %v77_v1 = vld [vmem:[#allocation6 + $0x8] sm:$0xff]  ;;  %s642_s21 = smov [#allocation9]  }
  0x37   :  { %v78_v2 = vld [vmem:[#allocation6 + $0x10] sm:$0xff]  ;;  %v467_v3 = vpack.c.bf16 %v77_v1, %v76_v0  ;;  %v79_v4 = vld [vmem:[#allocation6 + $0x18] sm:$0xff]  ;;  %v80_v6 = vld [vmem:[#allocation6 + $0x20] sm:$0xff]  ;;  %v289_v0 = vlaneseq  ;;  %s343_s22 = sshll.u32 %s642_s21, 4  ;;  %s344_s22 = int_to_ptr.vmem [resolvable:$true] %s343_s22 }
  0x38   :  { %v471_v5 = vpack.c.bf16 %v79_v4, %v78_v2  ;;  %v81_v7 = vld [vmem:[#allocation6 + $0x28] sm:$0xff]  ;;  %v82_v9 = vld [vmem:[#allocation6 + $0x30] sm:$0xff]  ;;  %v83_v10 = vld [vmem:[#allocation6 + $0x38] sm:$0xff]  ;;  %s608_s23 = scalar_lea.vmem %s344_s22, 256  ;;  %p613_p11 = scmp.lt.s32.totalorder %s344_s22, %s344_s22 }
  0x39   :  { %468 = vmatprep.subr.bf16.mxu0 %v467_v3  ;;  %v475_v8 = vpack.c.bf16 %v81_v7, %v80_v6  ;;  %v735_v11 = vld [vmem:[#allocation3] sm:$0xff]  ;;  %v178_v12 = vld [vmem:[#allocation8] sm:$0xff]  ;;  %v179_v13 = vld [vmem:[#allocation8 + $0x8] sm:$0xff]  ;;  %v479_v20 = vpack.c.bf16 %v83_v10, %v82_v9  ;;  %v290_v1 = vand.u32 127, %v289_v0  ;;  %v641_v6 = vmov 0.0   ;;  %p609_p10 = scmp.ne.s32.totalorder %s344_s22, %s608_s23  ;;  %p614_p12 = scmp.lt.s32.totalorder %s608_s23, %s608_s23 }
  0x3a   :  { %470 = vmatpush3.bf16.msra.mxu0 %v467_v3  ;;  %429 = vmatprep.mubr.f32.mxu0 %v735_v11  ;;  %v180_v14 = vld [vmem:[#allocation8 + $0x10] sm:$0xff]  ;;  %v499_v15 = vpack.c.bf16 %v179_v13, %v178_v12  ;;  %v181_v16 = vld [vmem:[#allocation8 + $0x18] sm:$0xff]  ;;  %v182_v18 = vld [vmem:[#allocation8 + $0x20] sm:$0xff] }
  0x3b   :  { %472 = vmatprep.subr.bf16.mxu0 %v471_v5  ;;  %v503_v17 = vpack.c.bf16 %v181_v16, %v180_v14  ;;  %v183_v19 = vld [vmem:[#allocation8 + $0x28] sm:$0xff]  ;;  %v84_v21 = vld [vmem:[#allocation6 + $0x40] sm:$0xff]  ;;  %v184_v24 = vld [vmem:[#allocation8 + $0x30] sm:$0xff]  ;;  %vm291_vm0 = vcmp.lt.s32.totalorder %v290_v1, 32  ;;  %p615_p13 = por %p614_p12, %p613_p11 }
  0x3c   :  { %500 = vmatprep.subr.bf16.mxu1 %v499_v15  ;;  %v85_v22 = vld [vmem:[#allocation6 + $0x48] sm:$0xff]  ;;  %v507_v23 = vpack.c.bf16 %v183_v19, %v182_v18  ;;  %v185_v25 = vld [vmem:[#allocation8 + $0x38] sm:$0xff]  ;;  %v86_v27 = vld [vmem:[#allocation6 + $0x50] sm:$0xff]  ;;  %v358_v7 = vsel %vm291_vm0, 1.0, %v641_v6 }
  0x3d   :  { %502 = vmatpush3.bf16.msra.mxu1 %v499_v15  ;;  %v483_v26 = vpack.c.bf16 %v85_v22, %v84_v21  ;;  %v87_v28 = vld [vmem:[#allocation6 + $0x58] sm:$0xff]  ;;  %v511_v29 = vpack.c.bf16 %v185_v25, %v184_v24  ;;  %v186_v30 = vld [vmem:[#allocation8 + $0x40] sm:$0xff]  ;;  %v187_v31 = vld [vmem:[#allocation8 + $0x48] sm:$0xff]  ;;  %p616_p0 = pnand %p615_p13, %p609_p10 }
  0x3e   :  { %474 = vmatpush3.bf16.msra.mxu0 %v471_v5  ;;  %504 = vmatprep.subr.bf16.mxu1 %v503_v17  ;;  %v487_v32 = vpack.c.bf16 %v87_v28, %v86_v27  ;;  %v88_v33 = vld [vmem:[#allocation6 + $0x60] sm:$0xff]  ;;  %v89_v34 = vld [vmem:[#allocation6 + $0x68] sm:$0xff]  ;;  %v515_v35 = vpack.c.bf16 %v187_v31, %v186_v30  ;;  %v188_v36 = vld [vmem:[#allocation8 + $0x50] sm:$0xff] }
  0x3f   :  { %476 = vmatprep.subr.bf16.mxu0 %v475_v8  ;;  %v189_v37 = vld [vmem:[#allocation8 + $0x58] sm:$0xff]  ;;  %v491_v38 = vpack.c.bf16 %v89_v34, %v88_v33  ;;  %v90_v39 = vld [vmem:[#allocation6 + $0x70] sm:$0xff]  ;;  %v190_v42 = vld [vmem:[#allocation8 + $0x60] sm:$0xff] }
  0x40   :  { %v91_v40 = vld [vmem:[#allocation6 + $0x78] sm:$0xff]  ;;  %v519_v41 = vpack.c.bf16 %v189_v37, %v188_v36  ;;  %v191_v43 = vld [vmem:[#allocation8 + $0x68] sm:$0xff]  ;;  %v192_v47 = vld [vmem:[#allocation8 + $0x70] sm:$0xff] }
  0x41   :  { %506 = vmatpush3.bf16.msra.mxu1 %v503_v17  ;;  %v495_v44 = vpack.c.bf16 %v91_v40, %v90_v39  ;;  %v523_v45 = vpack.c.bf16 %v191_v43, %v190_v42  ;;  %v75_v46 = vld [vmem:[#allocation3 + $0x8] sm:$0xff]  ;;  %v356_v50 = vld [vmem:[%s768_s2] ss:$0 sm:$0xff] }
  0x42   :  { %478 = vmatpush3.bf16.msra.mxu0 %v475_v8  ;;  %508 = vmatprep.subr.bf16.mxu1 %v507_v23  ;;  %v193_v48 = vld [vmem:[#allocation8 + $0x78] sm:$0xff]  ;;  %v357_v57 = vld [vmem:[%s770_s4] ss:$0 sm:$0xff] }
  0x43   :  { %480 = vmatprep.subr.bf16.mxu0 %v479_v20  ;;  %v527_v49 = vpack.c.bf16 %v193_v48, %v192_v47  ;;  %v359_v21 = vld [vmem:[%s771_s5] ss:$0 sm:$0xff] }
  0x45   :  { %510 = vmatpush3.bf16.msra.mxu1 %v507_v23  ;;  %v360_v23 = vld [vmem:[%s772_s6] ss:$0 sm:$0xff] }
  0x46   :  { %482 = vmatpush3.bf16.msra.mxu0 %v479_v20  ;;  %512 = vmatprep.subr.bf16.mxu1 %v511_v29 }
  0x47   :  { %484 = vmatprep.subr.bf16.mxu0 %v483_v26 }
  0x49   :  { %514 = vmatpush3.bf16.msra.mxu1 %v511_v29 }
  0x4a   :  { %486 = vmatpush3.bf16.msra.mxu0 %v483_v26  ;;  %516 = vmatprep.subr.bf16.mxu1 %v515_v35 }
  0x4b   :  { %488 = vmatprep.subr.bf16.mxu0 %v487_v32 }
  0x4d   :  { %518 = vmatpush3.bf16.msra.mxu1 %v515_v35 }
  0x4e   :  { %490 = vmatpush3.bf16.msra.mxu0 %v487_v32  ;;  %520 = vmatprep.subr.bf16.mxu1 %v519_v41 }
  0x4f   :  { %492 = vmatprep.subr.bf16.mxu0 %v491_v38 }
  0x51   :  { %522 = vmatpush3.bf16.msra.mxu1 %v519_v41 }
  0x52   :  { %494 = vmatpush3.bf16.msra.mxu0 %v491_v38  ;;  %524 = vmatprep.subr.bf16.mxu1 %v523_v45 }
  0x53   :  { %496 = vmatprep.subr.bf16.mxu0 %v495_v44 }
  0x55   :  { %526 = vmatpush3.bf16.msra.mxu1 %v523_v45 }
  0x56   :  { %498 = vmatpush3.bf16.msra.mxu0 %v495_v44  ;;  %528 = vmatprep.subr.bf16.mxu1 %v527_v49 }
  0x59   :  { %430 = vmatmul.mubr.f32.vlgmr.msra.gmra.mrb[0].mxu0 %v75_v46  ;;  %530 = vmatpush3.bf16.msra.mxu1 %v527_v49 }
 0x12c   :  { %v431_v51 = vpop.f32.mrb[0].mxu0 }
 0x12d   :  { %v171_v52 = vadd.f32 %v431_v51, %v356_v50  ;;  %v165_v53 = vpop.f32.mrb[1].mxu0 }
 0x12e   :  { %v166_v54 = vadd.f32 %v356_v50, %v165_v53 }
 0x12f   :  { %v175_v56 = vmax.f32 %v171_v52, 0.0 }
 0x130   :  { %v174_v55 = vmax.f32 %v166_v54, 0.0 }
 0x132   :  { %464 = vmatprep.mubr.f32.mxu1 %v174_v55 }
 0x133   :  { %465 = vmatmul.mubr.f32.vlgmr.msra.gmra.mrb[0].mxu1 %v175_v56 }
 0x206   :  { %v466_v58 = vpop.f32.mrb[0].mxu1 }
 0x207   :  { %v260_v59 = vpop.f32.mrb[1].mxu1  ;;  %v286_v61 = vadd.f32 %v466_v58, %v357_v57 }
 0x208   :  { %v285_v60 = vadd.f32 %v357_v57, %v260_v59 }
 0x209   :  { %v288_v63 = vadd.f32 %v286_v61, %v75_v46 }
 0x20a   :  { %v287_v62 = vadd.f32 %v285_v60, %v735_v11 }
 0x20c   :  { %294 = vadd.xlane.f32.xlu0 %v287_v62 }
 0x210   :  { %296 = vadd.xlane.f32.xlu0 %v288_v63 }
 0x299   :  { %v295_v2 = vpop.xlane.xlu0 %294 }
 0x29a   :  { %v298_v3 = vmul.f32 0.03125, %v295_v2 }
 0x29c   :  { %v300_v4 = vsub.f32 %v287_v62, %v298_v3 }
 0x29d   :  { %v297_v5 = vpop.xlane.xlu0 %296 }
 0x29e   :  { %v299_v8 = vmul.f32 0.03125, %v297_v5  ;;  %v302_v9 = vmul.f32 %v300_v4, %v300_v4 }
 0x2a0   :  { %v301_v10 = vsub.f32 %v288_v63, %v299_v8  ;;  %v304_v12 = vmul.f32 %v358_v7, %v302_v9 }
 0x2a2   :  { %306 = vadd.xlane.f32.xlu1 %v304_v12  ;;  %v303_v13 = vmul.f32 %v301_v10, %v301_v10 }
 0x2a4   :  { %v305_v14 = vmul.f32 %v358_v7, %v303_v13 }
 0x2a6   :  { %308 = vadd.xlane.f32.xlu1 %v305_v14 }
 0x32f   :  { %v307_v11 = vpop.xlane.xlu1 %306 }
 0x330   :  { %v310_v15 = vmul.f32 0.03125, %v307_v11 }
 0x332   :  { %v312_v16 = vadd.f32 1e-12, %v310_v15 }
 0x333   :  { %v309_v17 = vpop.xlane.xlu1 %308 }
 0x334   :  { %538 = vrsqrt.f32 %v312_v16  ;;  %v311_v18 = vmul.f32 0.03125, %v309_v17 }
 0x336   :  { %v313_v19 = vadd.f32 1e-12, %v311_v18 }
 0x338   :  { %540 = vrsqrt.f32 %v313_v19 }
 0x33e   :  { %v539_v20 = vpop.eup %538 }
 0x33f   :  { %v316_v22 = vmul.f32 %v539_v20, %v300_v4 }
 0x341   :  { %v325_v24 = vmul.f32 %v359_v21, %v316_v22 }
 0x342   :  { %v541_v25 = vpop.eup %540 }
 0x343   :  { %v317_v26 = vmul.f32 %v541_v25, %v301_v10  ;;  %v334_v27 = vadd.f32 %v360_v23, %v325_v24 }
 0x345   :  { %v326_v28 = vmul.f32 %v359_v21, %v317_v26  ;;  %336 = vst [vmem:[#allocation9] sm:$0xff] %v334_v27 }
 0x347   :  { %v335_v29 = vadd.f32 %v360_v23, %v326_v28 }
 0x349   :  { %337 = vst [vmem:[#allocation9 + $0x8] sm:$0xff] %v335_v29 }
 0x34a   :  { %619 = shalt.err (!%p616_p0)
}
 0x34b   :  { %s620_s24 = scalar_lea.hbm %s773_s7, 256 }
 0x34c   :  { %p621_p1 = scmp.ne.s32.totalorder %s773_s7, %s620_s24  ;;  %p624_p2 = scmp.lt.u32.totalorder %s620_s24, %s773_s7 }
 0x34e   :  { %p626_p3 = pnand %p624_p2, %p621_p1 }
 0x350   :  { %629 = shalt.err (!%p626_p3)
}
 0x351   :  { %349 = dma.vmem_to_hbm [thread:$0]  %s344_s22, 256, %s773_s7, [#allocation5], %s638_s13, %s638_s13, %s639_s14  }
 0x352   :  { %634 = dma.done.wait [#allocation5], 256  }
 0x353   :  { %635 = vsyncadd [#allocation5], 4294967040 }
 0x354   :  { %353 = vsyncpa [#allocation4], 1 }
 0x355   :  { %354 = vsyncpa [#allocation7], 1 }
 0x356   :  { %355 = vsyncpa [#allocation5], 1 }

</bundles_post_ra>
